<compile_context>
chip_gen: v7x
topology: tpu7x:2x2x1
jax: 0.10.0
libtpu: 0.0.40
codegen_flags: <defaults>
</compile_context>

<pallas_src>
import jax
import jax.numpy as jnp
from jax.experimental import pallas as pl
from jax.experimental.pallas import tpu as pltpu

IN_F = 10
HID_F = 10
OUT_F = 5
LANE = 128
MAX_TILE_B = 131072  # ~16 MiB of double-buffered x+out blocks at this width


def _mlp_kernel(x_ref, w1_ref, b1_ref, w2_ref, b2_ref, o_ref):
    # x_ref : [IN_F, tile_b]  bf16   (batch on the lane axis)
    # w1_ref: [HID_F, IN_F]   bf16   b1_ref: [HID_F, 1] f32
    # w2_ref: [OUT_F, HID_F]  bf16   b2_ref: [OUT_F, 1] f32
    # o_ref : [OUT_F, tile_b] f32
    x = x_ref[...]
    h = jnp.dot(w1_ref[...], x, preferred_element_type=jnp.float32) + b1_ref[...]
    h = jnp.maximum(h, 0.0).astype(jnp.bfloat16)
    out = jnp.dot(w2_ref[...], h, preferred_element_type=jnp.float32) + b2_ref[...]
    o_ref[...] = out.astype(o_ref.dtype)


def _round_up(n, m):
    return ((n + m - 1) // m) * m


def _num_tensorcores():
    # v7x has 2 TensorCores per chip; v5e/v6e have 1.  Best-effort detection so the
    # "parallel" batch axis only gets split where it actually helps.
    try:
        dev = jax.devices()[0]
        kind = str(getattr(dev, "device_kind", "") or "").lower()
        if "v7" in kind:
            return 2
        ncores = getattr(dev, "num_cores", None)
        if isinstance(ncores, int) and ncores > 0:
            return ncores
    except Exception:
        pass
    return 1


def _choose_tile(batch, max_tile_b):
    padded_min = _round_up(max(int(batch), 1), LANE)
    tile_b = min(padded_min, max(LANE, _round_up(int(max_tile_b), LANE)))
    ncores = _num_tensorcores()
    if ncores >= 2 and padded_min >= ncores * LANE:
        # Cap the tile so the parallel grid has >= ncores steps (megacore sharding
        # on v7x).  Single-TC chips keep the largest tile (fewest grid steps).
        tile_b = min(tile_b, _round_up(pl.cdiv(padded_min, ncores), LANE))
    return tile_b


def toy_mp_model_forward_lane_major(x_t, w1, b1, w2, b2, *, max_tile_b=MAX_TILE_B):
    """Zero-glue entry point: x_t is [10, B] (batch on the lane axis).

    Returns [5, B] float32.  Prefer this when the producer can supply x in
    lane-major bf16 and the consumer accepts [5, B] — it avoids all HBM
    transpose/cast/pad passes outside the kernel.
    """
    assert x_t.shape[0] == IN_F, x_t.shape
    batch = x_t.shape[1]

    x_bf = x_t if x_t.dtype == jnp.bfloat16 else x_t.astype(jnp.bfloat16)
    w1_b = jnp.asarray(w1, jnp.float32).astype(jnp.bfloat16)   # [10, 10], torch [out,in]
    w2_b = jnp.asarray(w2, jnp.float32).astype(jnp.bfloat16)   # [ 5, 10]
    b1_2d = jnp.asarray(b1, jnp.float32).reshape(HID_F, 1)
    b2_2d = jnp.asarray(b2, jnp.float32).reshape(OUT_F, 1)

    tile_b = _choose_tile(batch, max_tile_b)
    # Non-divisible grid: the last block may be partial.  OOB input lanes read
    # unspecified data confined to columns that are never written back (columns are
    # independent through W @ x), and OOB output lanes are masked by Pallas.
    grid = (pl.cdiv(batch, tile_b),)
    moved_cols = grid[0] * tile_b

    # Honest HBM volume: x block moves 16 sublanes (bf16 pad of 10 rows), out block
    # moves 8 sublanes (f32 pad of 5 rows); weights/biases negligible, VMEM-resident.
    cost = pl.CostEstimate(
        flops=2 * moved_cols * (IN_F * HID_F + HID_F * OUT_F),
        transcendentals=0,
        bytes_accessed=(16 * moved_cols * 2          # x read (sublane-padded bf16)
                        + 8 * moved_cols * 4         # out write (sublane-padded f32)
                        + 2 * 16 * LANE * 2          # weights (tile-padded, bf16)
                        + 2 * 8 * LANE * 4),         # biases (tile-padded, f32)
    )

    # Double-buffered x + out blocks (sublane-padded) plus headroom for weights.
    buf_bytes = 2 * (16 * tile_b * 2) + 2 * (8 * tile_b * 4)
    vmem_limit = int(min(96 * 1024 * 1024,
                         max(32 * 1024 * 1024, buf_bytes + (2 << 20))))

    resident = lambda shape: pl.BlockSpec(shape, lambda i: (0, 0))

    out_t = pl.pallas_call(
        _mlp_kernel,
        out_shape=jax.ShapeDtypeStruct((OUT_F, batch), jnp.float32),
        grid=grid,
        in_specs=[pl.BlockSpec((IN_F, tile_b), lambda i: (0, i)),
                  resident((HID_F, IN_F)),
                  resident((HID_F, 1)),
                  resident((OUT_F, HID_F)),
                  resident((OUT_F, 1))],
        out_specs=pl.BlockSpec((OUT_F, tile_b), lambda i: (0, i)),
        compiler_params=pltpu.CompilerParams(
            dimension_semantics=("parallel",),
            vmem_limit_bytes=vmem_limit),
        cost_estimate=cost,
    )(x_bf, w1_b, b1_2d, w2_b, b2_2d)
    return out_t


def toy_mp_model_forward(x, w1, b1, w2, b2, *, max_tile_b=MAX_TILE_B):
    """PyTorch-layout forward: relu(x @ w1.T + b1) @ w2.T + b2.

    x: [B, 10] -> [B, 5] float32.  The transpose/cast here is the only layout glue;
    push it to the producer/consumer by calling toy_mp_model_forward_lane_major.
    """
    x_t = jnp.asarray(x, jnp.float32).astype(jnp.bfloat16).T      # [10, B], bf16
    out_t = toy_mp_model_forward_lane_major(x_t, w1, b1, w2, b2,
                                            max_tile_b=max_tile_b)
    return out_t.T                                                # [B, 5], f32


def _reference_f32(x, w1, b1, w2, b2):
    h = jnp.maximum(x @ w1.T + b1, 0.0)
    return h @ w2.T + b2


def _reference_mixed(x, w1, b1, w2, b2):
    # Same bf16-in / f32-accumulate precision as the kernel, for a tight check.
    xb = x.astype(jnp.bfloat16)
    w1b = jnp.asarray(w1, jnp.float32).astype(jnp.bfloat16)
    w2b = jnp.asarray(w2, jnp.float32).astype(jnp.bfloat16)
    h = jnp.dot(xb, w1b.T, preferred_element_type=jnp.float32) + b1
    h = jnp.maximum(h, 0.0).astype(jnp.bfloat16)
    return jnp.dot(h, w2b.T, preferred_element_type=jnp.float32) + b2


if __name__ == "__main__":
    key = jax.random.PRNGKey(0)
    k_x, k_w1, k_b1, k_w2, k_b2 = jax.random.split(key, 5)

    batch = 300  # not a multiple of 128 -> exercises the masked partial-block path

    bound1 = 1.0 / jnp.sqrt(jnp.float32(IN_F))
    bound2 = 1.0 / jnp.sqrt(jnp.float32(HID_F))
    w1 = jax.random.uniform(k_w1, (HID_F, IN_F), jnp.float32, -bound1, bound1)
    b1 = jax.random.uniform(k_b1, (HID_F,), jnp.float32, -bound1, bound1)
    w2 = jax.random.uniform(k_w2, (OUT_F, HID_F), jnp.float32, -bound2, bound2)
    b2 = jax.random.uniform(k_b2, (OUT_F,), jnp.float32, -bound2, bound2)
    x = jax.random.normal(k_x, (batch, IN_F), jnp.float32)

    ref_mixed = _reference_mixed(x, w1, b1, w2, b2)
    ref_f32 = _reference_f32(x, w1, b1, w2, b2)

    # 1) Default tile path (single tile on single-TC chips, 2 tiles on v7x).
    out = jax.block_until_ready(toy_mp_model_forward(x, w1, b1, w2, b2))
    assert out.shape == (batch, OUT_F), out.shape
    assert jnp.allclose(out, ref_mixed, atol=1e-4, rtol=1e-4), \
        "mismatch vs precision-matched reference (default-tile path)"
    assert jnp.allclose(out, ref_f32, atol=5e-2, rtol=5e-2), \
        "mismatch vs float32 reference (default-tile path)"

    # 2) Multi-step grid path: force tile_b=128 -> grid=(3,), last block partial.
    out_multi = jax.block_until_ready(
        toy_mp_model_forward(x, w1, b1, w2, b2, max_tile_b=128))
    assert jnp.allclose(out_multi, ref_mixed, atol=1e-4, rtol=1e-4), \
        "mismatch vs precision-matched reference (multi-tile path)"

    # 3) Tiny batch: block wider than the batch -> fully masked tail columns.
    x_small = jax.random.normal(k_x, (2, IN_F), jnp.float32)
    out_small = jax.block_until_ready(toy_mp_model_forward(x_small, w1, b1, w2, b2))
    assert out_small.shape == (2, OUT_F), out_small.shape
    assert jnp.allclose(out_small, _reference_mixed(x_small, w1, b1, w2, b2),
                        atol=1e-4, rtol=1e-4), "mismatch (tiny-batch path)"

    print("KERNEL_OK")
</pallas_src>

<mosaic_0001>
module attributes {stable_mosaic.version = 11 : i64} {
  func.func @_mlp_kernel(%arg0: i32, %arg1: memref<10x384xbf16, #tpu.memory_space<vmem>>, %arg2: memref<10x10xbf16, #tpu.memory_space<vmem>>, %arg3: memref<10x1xf32, #tpu.memory_space<vmem>>, %arg4: memref<5x10xbf16, #tpu.memory_space<vmem>>, %arg5: memref<5x1xf32, #tpu.memory_space<vmem>>, %arg6: memref<5x384xf32, #tpu.memory_space<vmem>>) attributes {dimension_semantics = [#tpu.dimension_semantics<parallel>], iteration_bounds = array<i64: 1>, scalar_prefetch = 0 : i64, scratch_operands = 0 : i64, tpu.core_type = #tpu.core_type<tc>, window_params = [{transform_indices = @transform_0, window_bounds = array<i64: 10, 384>}, {pipeline_mode = #tpu.pipeline_mode<synchronous>, transform_indices = @transform_1, window_bounds = array<i64: 10, 10>}, {pipeline_mode = #tpu.pipeline_mode<synchronous>, transform_indices = @transform_2, window_bounds = array<i64: 10, 1>}, {pipeline_mode = #tpu.pipeline_mode<synchronous>, transform_indices = @transform_3, window_bounds = array<i64: 5, 10>}, {pipeline_mode = #tpu.pipeline_mode<synchronous>, transform_indices = @transform_4, window_bounds = array<i64: 5, 1>}, {transform_indices = @transform_5, window_bounds = array<i64: 5, 384>}]} {
    %c0 = arith.constant 0 : index
    %c0_0 = arith.constant 0 : index
    %0 = vector.load %arg1[%c0, %c0_0] : memref<10x384xbf16, #tpu.memory_space<vmem>>, vector<10x384xbf16>
    %c0_1 = arith.constant 0 : index
    %c0_2 = arith.constant 0 : index
    %1 = vector.load %arg2[%c0_1, %c0_2] : memref<10x10xbf16, #tpu.memory_space<vmem>>, vector<10x10xbf16>
    %cst = arith.constant dense<0.000000e+00> : vector<10x384xf32>
    %2 = tpu.matmul %1, %0, %cst {dimension_numbers = #tpu.dot_dimension_numbers<[1], [0], [0], [1], [0, 0, 1, 1], [], []>} : vector<10x10xbf16>, vector<10x384xbf16>, vector<10x384xf32> -> vector<10x384xf32>
    %c0_3 = arith.constant 0 : index
    %c0_4 = arith.constant 0 : index
    %3 = vector.load %arg3[%c0_3, %c0_4] : memref<10x1xf32, #tpu.memory_space<vmem>>, vector<10x1xf32>
    %4 = vector.broadcast %3 : vector<10x1xf32> to vector<10x384xf32>
    %5 = arith.addf %2, %4 : vector<10x384xf32>
    %cst_5 = arith.constant 0.000000e+00 : f32
    %6 = vector.broadcast %cst_5 : f32 to vector<10x384xf32>
    %7 = arith.maximumf %5, %6 : vector<10x384xf32>
    %8 = arith.truncf %7 : vector<10x384xf32> to vector<10x384xbf16>
    %c0_6 = arith.constant 0 : index
    %c0_7 = arith.constant 0 : index
    %9 = vector.load %arg4[%c0_6, %c0_7] : memref<5x10xbf16, #tpu.memory_space<vmem>>, vector<5x10xbf16>
    %cst_8 = arith.constant dense<0.000000e+00> : vector<5x384xf32>
    %10 = tpu.matmul %9, %8, %cst_8 {dimension_numbers = #tpu.dot_dimension_numbers<[1], [0], [0], [1], [0, 0, 1, 1], [], []>} : vector<5x10xbf16>, vector<10x384xbf16>, vector<5x384xf32> -> vector<5x384xf32>
    %c0_9 = arith.constant 0 : index
    %c0_10 = arith.constant 0 : index
    %11 = vector.load %arg5[%c0_9, %c0_10] : memref<5x1xf32, #tpu.memory_space<vmem>>, vector<5x1xf32>
    %12 = vector.broadcast %11 : vector<5x1xf32> to vector<5x384xf32>
    %13 = arith.addf %10, %12 : vector<5x384xf32>
    %c0_11 = arith.constant 0 : index
    %c0_12 = arith.constant 0 : index
    %14 = vector.load %arg6[%c0_11, %c0_12] : memref<5x384xf32, #tpu.memory_space<vmem>>, vector<5x384xf32>
    tpu.vector_store %arg6[%c0_11, %c0_12], %13 {strides = array<i32>} : memref<5x384xf32, #tpu.memory_space<vmem>>, vector<5x384xf32>,
    return
  }
  func.func @transform_0(%arg0: i32) -> (i32, i32) {
    %c0_i32 = arith.constant 0 : i32
    %c0_i32_0 = arith.constant 0 : i32
    return %c0_i32, %arg0 : i32, i32
  }
  func.func @transform_1(%arg0: i32) -> (i32, i32) {
    %c0_i32 = arith.constant 0 : i32
    %c0_i32_0 = arith.constant 0 : i32
    %c0_i32_1 = arith.constant 0 : i32
    return %c0_i32, %c0_i32_0 : i32, i32
  }
  func.func @transform_2(%arg0: i32) -> (i32, i32) {
    %c0_i32 = arith.constant 0 : i32
    %c0_i32_0 = arith.constant 0 : i32
    %c0_i32_1 = arith.constant 0 : i32
    return %c0_i32, %c0_i32_0 : i32, i32
  }
  func.func @transform_3(%arg0: i32) -> (i32, i32) {
    %c0_i32 = arith.constant 0 : i32
    %c0_i32_0 = arith.constant 0 : i32
    %c0_i32_1 = arith.constant 0 : i32
    return %c0_i32, %c0_i32_0 : i32, i32
  }
  func.func @transform_4(%arg0: i32) -> (i32, i32) {
    %c0_i32 = arith.constant 0 : i32
    %c0_i32_0 = arith.constant 0 : i32
    %c0_i32_1 = arith.constant 0 : i32
    return %c0_i32, %c0_i32_0 : i32, i32
  }
  func.func @transform_5(%arg0: i32) -> (i32, i32) {
    %c0_i32 = arith.constant 0 : i32
    %c0_i32_0 = arith.constant 0 : i32
    return %c0_i32, %arg0 : i32, i32
  }
}

</mosaic_0001>

<bundles_post_ra>
// kernel: tpu_custom_call.1
= control target key start
LH: loop header
LB: loop body
LE: loop exit
PB: predicated region body
PF: predicated region fallthrough
CT: control target
= control target key end

     0   :  { %10 = vsyncpa [#allocation3], 0  ;;  %s479_s0 = inlined_call_operand.vmem [shape: bf16[10,300], index: 0, kind: input, shape index: {}]   ;;  %s480_s1 = inlined_call_operand.hbm [shape: bf16[10,10], index: 1, kind: input, shape index: {}]   ;;  %s481_s2 = inlined_call_operand.vmem [shape: f32[10,1], index: 2, kind: input, shape index: {}]   ;;  %s482_s3 = inlined_call_operand.vmem [shape: bf16[5,10], index: 3, kind: input, shape index: {}]   ;;  %s483_s4 = inlined_call_operand.vmem [shape: f32[5,1], index: 4, kind: input, shape index: {}]   ;;  %s484_s5 = inlined_call_operand.hbm [shape: f32[5,300], index: 5, kind: output, shape index: {}]  }
   0x1   :  { %11 = vsyncpa [#allocation4], 0  ;;  %s385_s18 = smov [#allocation2]   ;;  %s337_s22 = scalar_lea.hbm %s480_s1, 128 }
   0x2   :  { %s19_s19 = sshll.u32 %s385_s18, 4  ;;  %p338_p0 = scmp.ne.s32.totalorder %s480_s1, %s337_s22  ;;  %s20_s19 = int_to_ptr.vmem [resolvable:$true] %s19_s19 }
   0x3   :  { %p341_p1 = scmp.lt.u32.totalorder %s337_s22, %s480_s1 }
   0x5   :  { %p343_p2 = pnand %p341_p1, %p338_p0 }
   0x7   :  { %346 = shalt.err (!%p343_p2)
}
   0x8   :  { %s347_s27 = scalar_lea.vmem %s20_s19, 128  ;;  %p352_p4 = scmp.lt.s32.totalorder %s20_s19, %s20_s19 }
   0x9   :  { %p348_p3 = scmp.ne.s32.totalorder %s20_s19, %s347_s27  ;;  %p353_p5 = scmp.lt.s32.totalorder %s347_s27, %s347_s27 }
   0xb   :  { %p354_p6 = por %p353_p5, %p352_p4 }
   0xd   :  { %p355_p7 = pnand %p354_p6, %p348_p3 }
   0xf   :  { %358 = shalt.err (!%p355_p7)
}
  0x10   :  { %s386_s28 = smov 64   ;;  %s387_s29 = smov 4  }
  0x11   :  { %25 = dma.hbm_to_vmem [thread:$0]  %s480_s1, 128, %s20_s19, [#allocation3], %s386_s28, %s386_s28, %s387_s29  }
  0x12   :  { %381 = dma.done.wait [#allocation3], 128  }
  0x13   :  { %382 = vsyncadd [#allocation3], 4294967168  ;;  %v388_v0 = vmov 0.0   ;;  %v389_v1 = vmov 0   ;;  %vm390_vm0 = vmmov 0   ;;  %vm76_vm1 = vcmask 1044480  }
  0x14   :  { %311 = vmatprep.subr.bf16.mxu1 %v388_v0  ;;  %118 = vmatprep.mubr.bf16.mxu0 %v389_v1  ;;  %v332_v2 = vld [vmem:[%s479_s0 + $0x4] ss:$12 sps:$4 sm:$0x1f]   ;;  %v334_v3 = vld [vmem:[%s479_s0] ss:$12 sps:$4 sm:$0x1f]  }
  0x15   :  { %313 = vmatprep.mubr.msk.bf16.mxu1 %vm390_vm0, %v388_v0  ;;  %330 = vset.pattern.permute.xlu0 %v389_v1  ;;  %v42_v4 = vld [vmem:[%s481_s2] sm:$0xff]  ;;  %v335_v5 = vld [vmem:[%s479_s0 + $0x8] ss:$12 sps:$4 sm:$0x1f]   ;;  %v78_v6 = vsel %vm76_vm1, %v334_v3, 0  ;;  %vm72_vm2 = vcmask 80896  }
  0x16   :  { %331 = vset.pattern.permute.xlu1 %v389_v1  ;;  %301 = vmatprep.subr.msk.bf16.mxu0 %vm76_vm1, %v332_v2  ;;  %v84_v7 = vsel %vm76_vm1, %v335_v5, 0  ;;  %v336_v8 = vld [vmem:[#allocation2] sm:$0x1f]   ;;  %v43_v9 = vld [vmem:[%s481_s2 + $0x8] sm:$0x3]  ;;  %s391_s17 = smov [#allocation5]  }
  0x17   :  { %46 = vperm.xlu0 %330, %v42_v4   ;;  %87 = vmatpush1.bf16.msra.mxu0 %v78_v6  ;;  %v180_v10 = vld [vmem:[%s483_s4] sm:$0x1f]  ;;  %s288_s18 = sshll.u32 %s391_s17, 4  ;;  %s289_s18 = int_to_ptr.vmem [resolvable:$true] %s288_s18 }
  0x18   :  { %312 = vmatpush3.bf16.msra.mxu1 %v84_v7  ;;  %183 = vperm.xlu1 %331, %v180_v10   ;;  %v179_v38 = vld [vmem:[%s482_s3] sm:$0x7]  ;;  %s359_s3 = scalar_lea.vmem %s289_s18, 384  ;;  %p364_p9 = scmp.lt.s32.totalorder %s289_s18, %s289_s18 }
  0x19   :  { %317 = vmatprep.subr.bf16.mxu1 %v388_v0  ;;  %p360_p8 = scmp.ne.s32.totalorder %s289_s18, %s359_s3  ;;  %p365_p10 = scmp.lt.s32.totalorder %s359_s3, %s359_s3 }
  0x1a   :  { %302 = vmatmul.mubr.msk.bf16.vlgmr.msra.gmra.mrb[0].mxu0 %vm72_vm2, %v336_v8 }
  0x1b   :  { %51 = vperm.xlu0 %330, %v43_v9   ;;  %314 = vmatmul.mubr.msk.bf16.vlgmr.msra.gmra.mrb[0].mxu1 %vm72_vm2, %v336_v8  ;;  %p366_p11 = por %p365_p10, %p364_p9 }
  0x1c   :  { %230 = vmatprep.mubr.bf16.mxu0 %v389_v1  ;;  %319 = vmatprep.mubr.msk.bf16.mxu1 %vm390_vm0, %v388_v0 }
  0x1d   :  { %p367_p12 = pnand %p366_p11, %p360_p8 }
  0x96   :  { %v47_v11 = vpop.permute.xlu0 %46 }
  0x97   :  { %v184_v39 = vpop.permute.xlu1 %183 }
  0x9a   :  { %v52_v12 = vpop.permute.xlu0 %51 }
  0xed   :  { %v120_v13 = vpop.f32.mrb[0].mxu0 }
  0xee   :  { %v121_v14 = vadd.f32 %v120_v13, %v47_v11  ;;  %v163_v15 = vpop.f32.mrb[0].mxu1  ;;  %v122_v16 = vpop.f32.mrb[1].mxu0 }
  0xef   :  { %v164_v17 = vadd.f32 %v163_v15, %v47_v11  ;;  %v123_v18 = vadd.f32 %v122_v16, %v47_v11  ;;  %v315_v19 = vpop.f32.mrb[1].mxu1  ;;  %v124_v20 = vpop.f32.mrb[2].mxu0 }
  0xf0   :  { %v125_v21 = vadd.f32 %v124_v20, %v52_v12  ;;  %v166_v22 = vpop.f32.mrb[2].mxu1  ;;  %v126_v23 = vpop.f32.mrb[3].mxu0  ;;  %v170_v27 = vmax.f32 %v121_v14, 0.0 }
  0xf1   :  { %v167_v24 = vadd.f32 %v166_v22, %v52_v12  ;;  %v127_v25 = vadd.f32 %v126_v23, %v52_v12  ;;  %v316_v26 = vpop.f32.mrb[3].mxu1  ;;  %v172_v29 = vmax.f32 %v164_v17, 0.0  ;;  %v171_v30 = vmax.f32 %v123_v18, 0.0 }
  0xf2   :  { %v173_v28 = vmax.f32 %v125_v21, 0.0 }
  0xf3   :  { %v175_v31 = vmax.f32 %v167_v24, 0.0  ;;  %v174_v32 = vmax.f32 %v127_v25, 0.0 }
  0xf4   :  { %v176_v33 = vpack.c.bf16 %v173_v28, %v170_v27 }
  0xf5   :  { %v178_v34 = vpack.c.bf16 %v175_v31, %v172_v29  ;;  %v177_v35 = vpack.c.bf16 %v174_v32, %v171_v30 }
  0xf6   :  { %v190_v36 = vsel %vm76_vm1, %v176_v33, 0 }
  0xf7   :  { %304 = vmatprep.subr.msk.bf16.mxu0 %vm76_vm1, %v177_v35  ;;  %v196_v37 = vsel %vm76_vm1, %v178_v34, 0 }
  0xf8   :  { %318 = vmatpush3.bf16.msra.mxu1 %v196_v37  ;;  %199 = vmatpush1.bf16.msra.mxu0 %v190_v36 }
  0xfb   :  { %305 = vmatmul.mubr.msk.bf16.vlgmr.msra.gmra.mrb[4].mxu0 %vm72_vm2, %v179_v38  ;;  %320 = vmatmul.mubr.msk.bf16.vlgmr.msra.gmra.mrb[4].mxu1 %vm72_vm2, %v179_v38 }
 0x1ce   :  { %v232_v40 = vpop.f32.mrb[4].mxu0  ;;  %v273_v41 = vpop.f32.mrb[4].mxu1 }
 0x1cf   :  { %v234_v42 = vpop.f32.mrb[5].mxu0  ;;  %v321_v43 = vpop.f32.mrb[5].mxu1  ;;  %v233_v44 = vadd.f32 %v232_v40, %v184_v39  ;;  %v274_v45 = vadd.f32 %v273_v41, %v184_v39 }
 0x1d0   :  { %v236_v46 = vpop.f32.mrb[6].mxu0  ;;  %v235_v47 = vadd.f32 %v234_v42, %v184_v39  ;;  %v276_v48 = vpop.f32.mrb[6].mxu1 }
 0x1d1   :  { %279 = vst [vmem:[#allocation5] sm:$0x1f] %v233_v44  ;;  %281 = vst [vmem:[#allocation5 + $0x10] sm:$0x1f] %v274_v45  ;;  %v237_v49 = vpop.f32.mrb[7].mxu0  ;;  %v322_v50 = vpop.f32.mrb[7].mxu1 }
 0x1d2   :  { %280 = vst [vmem:[#allocation5 + $0x8] sm:$0x1f] %v235_v47 }
 0x1d3   :  { %370 = shalt.err (!%p367_p12)
}
 0x1d4   :  { %s371_s21 = scalar_lea.hbm %s484_s5, 384 }
 0x1d5   :  { %p372_p13 = scmp.ne.s32.totalorder %s484_s5, %s371_s21  ;;  %p375_p0 = scmp.lt.u32.totalorder %s371_s21, %s484_s5 }
 0x1d7   :  { %p377_p1 = pnand %p375_p0, %p372_p13 }
 0x1d9   :  { %380 = shalt.err (!%p377_p1)
}
 0x1da   :  { %291 = dma.vmem_to_hbm [thread:$0]  %s289_s18, 384, %s484_s5, [#allocation4]  }
 0x1db   :  { %383 = dma.done.wait [#allocation4], 384  }
 0x1dc   :  { %384 = vsyncadd [#allocation4], 4294966912 }
 0x1dd   :  { %295 = vsyncpa [#allocation3], 1 }
 0x1de   :  { %296 = vsyncpa [#allocation4], 1 }

</bundles_post_ra>
